<compile_context>
chip_gen: v6e
topology: v6e:2x2x1
jax: 0.10.0
libtpu: 0.0.40
codegen_flags: <defaults>
</compile_context>

<pallas_src>
import functools

import jax
import jax.numpy as jnp
from jax.experimental import pallas as pl
from jax.experimental.pallas import tpu as pltpu


def _round_up(x, m):
    return (x + m - 1) // m * m


def actor_kernel(x_ref, w1_ref, b1_ref, w2_ref, b2_ref, w3_ref, b3_ref, q_ref):
    # x_ref:  (TM, Dp_in)     w1_ref: (Dp_in, Hp)   b1_ref: (1, Hp)
    # w2_ref: (Hp, Hp)        b2_ref: (1, Hp)
    # w3_ref: (Hp, Dp_out)    b3_ref: (1, Dp_out)
    # q_ref:  (TM, Dp_out)
    x = x_ref[...].astype(jnp.float32)

    h1 = jnp.dot(x, w1_ref[...], preferred_element_type=jnp.float32)
    h1 = jnp.maximum(h1 + b1_ref[...], 0.0)           # bias broadcast + ReLU

    h2 = jnp.dot(h1, w2_ref[...], preferred_element_type=jnp.float32)
    h2 = jnp.maximum(h2 + b2_ref[...], 0.0)

    q = jnp.dot(h2, w3_ref[...], preferred_element_type=jnp.float32)
    q = q + b3_ref[...]

    q_ref[...] = q.astype(q_ref.dtype)


def actor_forward(inputs, params, n_agents, n_actions, row_tile=512):
    """inputs: (B, T, input_dim) float32. Returns (B, T, n_agents, n_actions)."""
    B, T, d_in = inputs.shape
    w1, b1, w2, b2, w3, b3 = params
    H = w1.shape[1]
    d_out = w3.shape[1]
    assert d_out == n_agents * n_actions, (d_out, n_agents, n_actions)

    M = B * T

    # Lane-dense feature dims (multiples of 128); zero padding is mathematically exact.
    d_in_p = _round_up(d_in, 128)
    h_p = _round_up(H, 128)
    d_out_p = _round_up(d_out, 128)

    # Row tile: multiple of 8, capped by row_tile; pad M so every tile is full.
    tm = min(row_tile, _round_up(M, 8))
    m_p = _round_up(M, tm)

    x2d = inputs.reshape(M, d_in)
    x2d = jnp.pad(x2d, ((0, m_p - M), (0, d_in_p - d_in)))
    w1p = jnp.pad(w1, ((0, d_in_p - d_in), (0, h_p - H)))
    b1p = jnp.pad(b1, ((0, 0), (0, h_p - H)))
    w2p = jnp.pad(w2, ((0, h_p - H), (0, h_p - H)))
    b2p = jnp.pad(b2, ((0, 0), (0, h_p - H)))
    w3p = jnp.pad(w3, ((0, h_p - H), (0, d_out_p - d_out)))
    b3p = jnp.pad(b3, ((0, 0), (0, d_out_p - d_out)))

    grid = (m_p // tm,)

    # Weights/biases: constant block index -> DMA'd once, VMEM-resident across tiles.
    const2d = lambda i: (0, 0)

    # VMEM budget derived from the working set (double-buffered tiles + resident
    # weights + activation scratch) with headroom; safe on v7x's 64 MiB/TC.
    bpe = 4
    weight_bytes = (d_in_p * h_p + h_p * h_p + h_p * d_out_p + 2 * h_p + d_out_p) * bpe
    io_tile_bytes = (tm * d_in_p + tm * d_out_p) * bpe
    act_bytes = 2 * tm * h_p * bpe
    vmem_limit = int(min(48 << 20,
                         max(16 << 20,
                             2 * (weight_bytes + io_tile_bytes) + act_bytes + (4 << 20))))

    cost = pl.CostEstimate(
        flops=2 * m_p * (d_in_p * h_p + h_p * h_p + h_p * d_out_p),
        transcendentals=0,
        bytes_accessed=(m_p * d_in_p + m_p * d_out_p
                        + d_in_p * h_p + h_p * h_p + h_p * d_out_p) * bpe,
    )

    q2d = pl.pallas_call(
        actor_kernel,
        out_shape=jax.ShapeDtypeStruct((m_p, d_out_p), jnp.float32),
        grid=grid,
        in_specs=[
            pl.BlockSpec((tm, d_in_p), lambda i: (i, 0)),
            pl.BlockSpec((d_in_p, h_p), const2d),
            pl.BlockSpec((1, h_p), const2d),
            pl.BlockSpec((h_p, h_p), const2d),
            pl.BlockSpec((1, h_p), const2d),
            pl.BlockSpec((h_p, d_out_p), const2d),
            pl.BlockSpec((1, d_out_p), const2d),
        ],
        out_specs=pl.BlockSpec((tm, d_out_p), lambda i: (i, 0)),
        compiler_params=pltpu.CompilerParams(
            dimension_semantics=("parallel",),
            vmem_limit_bytes=vmem_limit,
        ),
        cost_estimate=cost,
    )(x2d, w1p, b1p, w2p, b2p, w3p, b3p)

    # Strip row/feature padding, then reshape like the PyTorch .view().
    return q2d[:M, :d_out].reshape(B, T, n_agents, n_actions)


def init_actor_params(key, input_dim, critic_dim, n_agents, n_actions):
    """Deterministic init mimicking PyTorch nn.Linear default (uniform ±1/sqrt(fan_in))."""
    d_out = n_agents * n_actions
    keys = jax.random.split(key, 6)

    def lin(kw, kb, fan_in, fan_out):
        bound = 1.0 / jnp.sqrt(jnp.float32(fan_in))
        w = jax.random.uniform(kw, (fan_in, fan_out), jnp.float32, -bound, bound)
        b = jax.random.uniform(kb, (1, fan_out), jnp.float32, -bound, bound)
        return w, b

    w1, b1 = lin(keys[0], keys[1], input_dim, critic_dim)
    w2, b2 = lin(keys[2], keys[3], critic_dim, critic_dim)
    w3, b3 = lin(keys[4], keys[5], critic_dim, d_out)
    return (w1, b1, w2, b2, w3, b3)


def actor_reference(inputs, params, n_agents, n_actions):
    """Pure-JAX reference for correctness check."""
    w1, b1, w2, b2, w3, b3 = params
    x = jnp.maximum(inputs @ w1 + b1[0], 0.0)
    x = jnp.maximum(x @ w2 + b2[0], 0.0)
    q = x @ w3 + b3[0]
    B, T = inputs.shape[:2]
    return q.reshape(B, T, n_agents, n_actions)


if __name__ == "__main__":
    # Small shapes consistent with the module: inputs (B, T, input_dim).
    B, T = 2, 8
    input_dim = 32
    critic_dim = 32
    n_agents = 2
    n_actions = 4

    key = jax.random.PRNGKey(0)
    k_in, k_par = jax.random.split(key)

    inputs = jax.random.normal(k_in, (B, T, input_dim), dtype=jnp.float32)
    params = init_actor_params(k_par, input_dim, critic_dim, n_agents, n_actions)

    fwd = jax.jit(functools.partial(actor_forward,
                                    n_agents=n_agents, n_actions=n_actions))
    q = fwd(inputs, params)
    jax.block_until_ready(q)

    q_ref = actor_reference(inputs, params, n_agents, n_actions)
    assert q.shape == (B, T, n_agents, n_actions), q.shape
    assert jnp.allclose(q, q_ref, atol=1e-4, rtol=1e-4), "mismatch vs reference"

    print("KERNEL_OK")
</pallas_src>

<mosaic_0001>
module attributes {stable_mosaic.version = 11 : i64} {
  func.func @actor_kernel(%arg0: i32, %arg1: memref<16x128xf32, #tpu.memory_space<vmem>>, %arg2: memref<128x128xf32, #tpu.memory_space<vmem>>, %arg3: memref<1x128xf32, #tpu.memory_space<vmem>>, %arg4: memref<128x128xf32, #tpu.memory_space<vmem>>, %arg5: memref<1x128xf32, #tpu.memory_space<vmem>>, %arg6: memref<128x128xf32, #tpu.memory_space<vmem>>, %arg7: memref<1x128xf32, #tpu.memory_space<vmem>>, %arg8: memref<16x128xf32, #tpu.memory_space<vmem>>) attributes {dimension_semantics = [#tpu.dimension_semantics<parallel>], iteration_bounds = array<i64: 1>, scalar_prefetch = 0 : i64, scratch_operands = 0 : i64, tpu.core_type = #tpu.core_type<tc>, window_params = [{transform_indices = @transform_0, window_bounds = array<i64: 16, 128>}, {pipeline_mode = #tpu.pipeline_mode<synchronous>, transform_indices = @transform_1, window_bounds = array<i64: 128, 128>}, {pipeline_mode = #tpu.pipeline_mode<synchronous>, transform_indices = @transform_2, window_bounds = array<i64: 1, 128>}, {pipeline_mode = #tpu.pipeline_mode<synchronous>, transform_indices = @transform_3, window_bounds = array<i64: 128, 128>}, {pipeline_mode = #tpu.pipeline_mode<synchronous>, transform_indices = @transform_4, window_bounds = array<i64: 1, 128>}, {pipeline_mode = #tpu.pipeline_mode<synchronous>, transform_indices = @transform_5, window_bounds = array<i64: 128, 128>}, {pipeline_mode = #tpu.pipeline_mode<synchronous>, transform_indices = @transform_6, window_bounds = array<i64: 1, 128>}, {transform_indices = @transform_7, window_bounds = array<i64: 16, 128>}]} {
    %c0 = arith.constant 0 : index
    %c0_0 = arith.constant 0 : index
    %0 = vector.load %arg1[%c0, %c0_0] : memref<16x128xf32, #tpu.memory_space<vmem>>, vector<16x128xf32>
    %c0_1 = arith.constant 0 : index
    %c0_2 = arith.constant 0 : index
    %1 = vector.load %arg2[%c0_1, %c0_2] : memref<128x128xf32, #tpu.memory_space<vmem>>, vector<128x128xf32>
    %cst = arith.constant dense<0.000000e+00> : vector<16x128xf32>
    %2 = tpu.matmul %0, %1, %cst {dimension_numbers = #tpu.dot_dimension_numbers<[1], [0], [0], [1], [0, 0, 1, 1], [], []>} : vector<16x128xf32>, vector<128x128xf32>, vector<16x128xf32> -> vector<16x128xf32>
    %c0_3 = arith.constant 0 : index
    %c0_4 = arith.constant 0 : index
    %3 = vector.load %arg3[%c0_3, %c0_4] : memref<1x128xf32, #tpu.memory_space<vmem>>, vector<1x128xf32>
    %4 = vector.broadcast %3 : vector<1x128xf32> to vector<16x128xf32>
    %5 = arith.addf %2, %4 : vector<16x128xf32>
    %cst_5 = arith.constant 0.000000e+00 : f32
    %6 = vector.broadcast %cst_5 : f32 to vector<16x128xf32>
    %7 = arith.maximumf %5, %6 : vector<16x128xf32>
    %c0_6 = arith.constant 0 : index
    %c0_7 = arith.constant 0 : index
    %8 = vector.load %arg4[%c0_6, %c0_7] : memref<128x128xf32, #tpu.memory_space<vmem>>, vector<128x128xf32>
    %cst_8 = arith.constant dense<0.000000e+00> : vector<16x128xf32>
    %9 = tpu.matmul %7, %8, %cst_8 {dimension_numbers = #tpu.dot_dimension_numbers<[1], [0], [0], [1], [0, 0, 1, 1], [], []>} : vector<16x128xf32>, vector<128x128xf32>, vector<16x128xf32> -> vector<16x128xf32>
    %c0_9 = arith.constant 0 : index
    %c0_10 = arith.constant 0 : index
    %10 = vector.load %arg5[%c0_9, %c0_10] : memref<1x128xf32, #tpu.memory_space<vmem>>, vector<1x128xf32>
    %11 = vector.broadcast %10 : vector<1x128xf32> to vector<16x128xf32>
    %12 = arith.addf %9, %11 : vector<16x128xf32>
    %cst_11 = arith.constant 0.000000e+00 : f32
    %13 = vector.broadcast %cst_11 : f32 to vector<16x128xf32>
    %14 = arith.maximumf %12, %13 : vector<16x128xf32>
    %c0_12 = arith.constant 0 : index
    %c0_13 = arith.constant 0 : index
    %15 = vector.load %arg6[%c0_12, %c0_13] : memref<128x128xf32, #tpu.memory_space<vmem>>, vector<128x128xf32>
    %cst_14 = arith.constant dense<0.000000e+00> : vector<16x128xf32>
    %16 = tpu.matmul %14, %15, %cst_14 {dimension_numbers = #tpu.dot_dimension_numbers<[1], [0], [0], [1], [0, 0, 1, 1], [], []>} : vector<16x128xf32>, vector<128x128xf32>, vector<16x128xf32> -> vector<16x128xf32>
    %c0_15 = arith.constant 0 : index
    %c0_16 = arith.constant 0 : index
    %17 = vector.load %arg7[%c0_15, %c0_16] : memref<1x128xf32, #tpu.memory_space<vmem>>, vector<1x128xf32>
    %18 = vector.broadcast %17 : vector<1x128xf32> to vector<16x128xf32>
    %19 = arith.addf %16, %18 : vector<16x128xf32>
    %c0_17 = arith.constant 0 : index
    %c0_18 = arith.constant 0 : index
    %20 = vector.load %arg8[%c0_17, %c0_18] : memref<16x128xf32, #tpu.memory_space<vmem>>, vector<16x128xf32>
    tpu.vector_store %arg8[%c0_17, %c0_18], %19 {strides = array<i32>} : memref<16x128xf32, #tpu.memory_space<vmem>>, vector<16x128xf32>,
    return
  }
  func.func @transform_0(%arg0: i32) -> (i32, i32) {
    %c0_i32 = arith.constant 0 : i32
    %c0_i32_0 = arith.constant 0 : i32
    return %arg0, %c0_i32 : i32, i32
  }
  func.func @transform_1(%arg0: i32) -> (i32, i32) {
    %c0_i32 = arith.constant 0 : i32
    %c0_i32_0 = arith.constant 0 : i32
    %c0_i32_1 = arith.constant 0 : i32
    return %c0_i32, %c0_i32_0 : i32, i32
  }
  func.func @transform_2(%arg0: i32) -> (i32, i32) {
    %c0_i32 = arith.constant 0 : i32
    %c0_i32_0 = arith.constant 0 : i32
    %c0_i32_1 = arith.constant 0 : i32
    return %c0_i32, %c0_i32_0 : i32, i32
  }
  func.func @transform_3(%arg0: i32) -> (i32, i32) {
    %c0_i32 = arith.constant 0 : i32
    %c0_i32_0 = arith.constant 0 : i32
    %c0_i32_1 = arith.constant 0 : i32
    return %c0_i32, %c0_i32_0 : i32, i32
  }
  func.func @transform_4(%arg0: i32) -> (i32, i32) {
    %c0_i32 = arith.constant 0 : i32
    %c0_i32_0 = arith.constant 0 : i32
    %c0_i32_1 = arith.constant 0 : i32
    return %c0_i32, %c0_i32_0 : i32, i32
  }
  func.func @transform_5(%arg0: i32) -> (i32, i32) {
    %c0_i32 = arith.constant 0 : i32
    %c0_i32_0 = arith.constant 0 : i32
    %c0_i32_1 = arith.constant 0 : i32
    return %c0_i32, %c0_i32_0 : i32, i32
  }
  func.func @transform_6(%arg0: i32) -> (i32, i32) {
    %c0_i32 = arith.constant 0 : i32
    %c0_i32_0 = arith.constant 0 : i32
    %c0_i32_1 = arith.constant 0 : i32
    return %c0_i32, %c0_i32_0 : i32, i32
  }
  func.func @transform_7(%arg0: i32) -> (i32, i32) {
    %c0_i32 = arith.constant 0 : i32
    %c0_i32_0 = arith.constant 0 : i32
    return %arg0, %c0_i32 : i32, i32
  }
}

</mosaic_0001>

<bundles_post_ra>
// kernel: actor_forward.1
= control target key start
LH: loop header
LB: loop body
LE: loop exit
PB: predicated region body
PF: predicated region fallthrough
CT: control target
= control target key end

     0   :  { %s699_s1 = inlined_call_operand.vmem [shape: f32[128,128], index: 1, kind: input, shape index: {}]   ;;  %s700_s0 = inlined_call_operand.vmem [shape: f32[16,128], index: 0, kind: input, shape index: {}]   ;;  %s701_s3 = inlined_call_operand.vmem [shape: f32[128,128], index: 3, kind: input, shape index: {}]   ;;  %s702_s5 = inlined_call_operand.vmem [shape: f32[128,128], index: 5, kind: input, shape index: {}]   ;;  %s703_s2 = inlined_call_operand.vmem [shape: f32[1,128], index: 2, kind: input, shape index: {}]   ;;  %s704_s4 = inlined_call_operand.vmem [shape: f32[1,128], index: 4, kind: input, shape index: {}]   ;;  %s705_s6 = inlined_call_operand.vmem [shape: f32[1,128], index: 6, kind: input, shape index: {}]   ;;  %s706_s7 = inlined_call_operand.vmem [shape: f32[16,128], index: 7, kind: output, shape index: {}]  }
   0x1   :  { %v43_v0 = vld [vmem:[%s699_s1 + $0x78] sm:$0xff]  ;;  %v42_v1 = vld [vmem:[%s699_s1 + $0x70] sm:$0xff]  ;;  %v41_v2 = vld [vmem:[%s699_s1 + $0x68] sm:$0xff] }
   0x2   :  { %389 = vmatprep.subr.mxu0 %v43_v0  ;;  %v40_v3 = vld [vmem:[%s699_s1 + $0x60] sm:$0xff]  ;;  %v39_v5 = vld [vmem:[%s699_s1 + $0x58] sm:$0xff]  ;;  %v142_v7 = vld [vmem:[%s701_s3 + $0x70] sm:$0xff] }
   0x3   :  { %390 = vmatpush3.msra.mxu0 %v43_v0  ;;  %v26_v4 = vld [vmem:[%s700_s0] sm:$0xff]  ;;  %v143_v6 = vld [vmem:[%s701_s3 + $0x78] sm:$0xff]  ;;  %v38_v8 = vld [vmem:[%s699_s1 + $0x50] sm:$0xff] }
   0x4   :  { %391 = vmatprep.subr.mxu0 %v42_v1  ;;  %421 = vmatprep.mubr.f32.mxu0 %v26_v4  ;;  %v141_v9 = vld [vmem:[%s701_s3 + $0x68] sm:$0xff]  ;;  %v140_v11 = vld [vmem:[%s701_s3 + $0x60] sm:$0xff]  ;;  %v139_v13 = vld [vmem:[%s701_s3 + $0x58] sm:$0xff] }
   0x5   :  { %392 = vmatpush3.msra.mxu0 %v42_v1  ;;  %424 = vmatprep.subr.mxu1 %v143_v6  ;;  %v37_v10 = vld [vmem:[%s699_s1 + $0x48] sm:$0xff]  ;;  %v36_v12 = vld [vmem:[%s699_s1 + $0x40] sm:$0xff]  ;;  %v35_v14 = vld [vmem:[%s699_s1 + $0x38] sm:$0xff] }
   0x6   :  { %393 = vmatprep.subr.mxu0 %v41_v2  ;;  %425 = vmatpush3.msra.mxu1 %v143_v6  ;;  %v138_v15 = vld [vmem:[%s701_s3 + $0x50] sm:$0xff]  ;;  %v137_v17 = vld [vmem:[%s701_s3 + $0x48] sm:$0xff]  ;;  %v136_v19 = vld [vmem:[%s701_s3 + $0x40] sm:$0xff] }
   0x7   :  { %394 = vmatpush3.msra.mxu0 %v41_v2  ;;  %426 = vmatprep.subr.mxu1 %v142_v7  ;;  %v34_v16 = vld [vmem:[%s699_s1 + $0x30] sm:$0xff]  ;;  %v33_v18 = vld [vmem:[%s699_s1 + $0x28] sm:$0xff]  ;;  %v32_v20 = vld [vmem:[%s699_s1 + $0x20] sm:$0xff] }
   0x8   :  { %395 = vmatprep.subr.mxu0 %v40_v3  ;;  %427 = vmatpush3.msra.mxu1 %v142_v7  ;;  %v135_v21 = vld [vmem:[%s701_s3 + $0x38] sm:$0xff]  ;;  %v134_v23 = vld [vmem:[%s701_s3 + $0x30] sm:$0xff]  ;;  %v133_v25 = vld [vmem:[%s701_s3 + $0x28] sm:$0xff] }
   0x9   :  { %396 = vmatpush3.msra.mxu0 %v40_v3  ;;  %428 = vmatprep.subr.mxu1 %v141_v9  ;;  %v31_v22 = vld [vmem:[%s699_s1 + $0x18] sm:$0xff]  ;;  %v30_v24 = vld [vmem:[%s699_s1 + $0x10] sm:$0xff]  ;;  %v29_v26 = vld [vmem:[%s699_s1 + $0x8] sm:$0xff] }
   0xa   :  { %397 = vmatprep.subr.mxu0 %v39_v5  ;;  %429 = vmatpush3.msra.mxu1 %v141_v9  ;;  %v132_v27 = vld [vmem:[%s701_s3 + $0x20] sm:$0xff]  ;;  %v27_v29 = vld [vmem:[%s700_s0 + $0x8] sm:$0xff]  ;;  %v131_v30 = vld [vmem:[%s701_s3 + $0x18] sm:$0xff] }
   0xb   :  { %398 = vmatpush3.msra.mxu0 %v39_v5  ;;  %430 = vmatprep.subr.mxu1 %v140_v11  ;;  %v28_v28 = vld [vmem:[%s699_s1] sm:$0xff]  ;;  %v130_v31 = vld [vmem:[%s701_s3 + $0x10] sm:$0xff]  ;;  %v129_v32 = vld [vmem:[%s701_s3 + $0x8] sm:$0xff] }
   0xc   :  { %399 = vmatprep.subr.mxu0 %v38_v8  ;;  %431 = vmatpush3.msra.mxu1 %v140_v11  ;;  %v128_v33 = vld [vmem:[%s701_s3] sm:$0xff]  ;;  %v243_v34 = vld [vmem:[%s702_s5 + $0x78] sm:$0xff]  ;;  %v242_v35 = vld [vmem:[%s702_s5 + $0x70] sm:$0xff] }
   0xd   :  { %400 = vmatpush3.msra.mxu0 %v38_v8  ;;  %432 = vmatprep.subr.mxu1 %v139_v13  ;;  %v241_v36 = vld [vmem:[%s702_s5 + $0x68] sm:$0xff]  ;;  %v240_v37 = vld [vmem:[%s702_s5 + $0x60] sm:$0xff]  ;;  %v239_v38 = vld [vmem:[%s702_s5 + $0x58] sm:$0xff] }
   0xe   :  { %401 = vmatprep.subr.mxu0 %v37_v10  ;;  %433 = vmatpush3.msra.mxu1 %v139_v13  ;;  %v238_v39 = vld [vmem:[%s702_s5 + $0x50] sm:$0xff]  ;;  %v237_v40 = vld [vmem:[%s702_s5 + $0x48] sm:$0xff]  ;;  %v236_v41 = vld [vmem:[%s702_s5 + $0x40] sm:$0xff] }
   0xf   :  { %402 = vmatpush3.msra.mxu0 %v37_v10  ;;  %434 = vmatprep.subr.mxu1 %v138_v15  ;;  %v235_v42 = vld [vmem:[%s702_s5 + $0x38] sm:$0xff]  ;;  %v234_v43 = vld [vmem:[%s702_s5 + $0x30] sm:$0xff]  ;;  %v233_v44 = vld [vmem:[%s702_s5 + $0x28] sm:$0xff] }
  0x10   :  { %403 = vmatprep.subr.mxu0 %v36_v12  ;;  %435 = vmatpush3.msra.mxu1 %v138_v15  ;;  %v232_v45 = vld [vmem:[%s702_s5 + $0x20] sm:$0xff]  ;;  %v231_v53 = vld [vmem:[%s702_s5 + $0x18] sm:$0xff]  ;;  %v230_v54 = vld [vmem:[%s702_s5 + $0x10] sm:$0xff] }
  0x11   :  { %404 = vmatpush3.msra.mxu0 %v36_v12  ;;  %436 = vmatprep.subr.mxu1 %v137_v17  ;;  %v332_v46 = vld [vmem:[%s703_s2] ss:$0 sm:$0xff]  ;;  %v229_v55 = vld [vmem:[%s702_s5 + $0x8] sm:$0xff] }
  0x12   :  { %405 = vmatprep.subr.mxu0 %v35_v14  ;;  %437 = vmatpush3.msra.mxu1 %v137_v17  ;;  %v228_v56 = vld [vmem:[%s702_s5] sm:$0xff] }
  0x13   :  { %406 = vmatpush3.msra.mxu0 %v35_v14  ;;  %438 = vmatprep.subr.mxu1 %v136_v19  ;;  %v333_v57 = vld [vmem:[%s704_s4] ss:$0 sm:$0xff] }
  0x14   :  { %407 = vmatprep.subr.mxu0 %v34_v16  ;;  %439 = vmatpush3.msra.mxu1 %v136_v19  ;;  %v334_v0 = vld [vmem:[%s705_s6] ss:$0 sm:$0xff] }
  0x15   :  { %408 = vmatpush3.msra.mxu0 %v34_v16  ;;  %440 = vmatprep.subr.mxu1 %v135_v21 }
  0x16   :  { %409 = vmatprep.subr.mxu0 %v33_v18  ;;  %441 = vmatpush3.msra.mxu1 %v135_v21 }
  0x17   :  { %410 = vmatpush3.msra.mxu0 %v33_v18  ;;  %442 = vmatprep.subr.mxu1 %v134_v23 }
  0x18   :  { %411 = vmatprep.subr.mxu0 %v32_v20  ;;  %443 = vmatpush3.msra.mxu1 %v134_v23 }
  0x19   :  { %412 = vmatpush3.msra.mxu0 %v32_v20  ;;  %444 = vmatprep.subr.mxu1 %v133_v25 }
  0x1a   :  { %413 = vmatprep.subr.mxu0 %v31_v22  ;;  %445 = vmatpush3.msra.mxu1 %v133_v25 }
  0x1b   :  { %414 = vmatpush3.msra.mxu0 %v31_v22  ;;  %446 = vmatprep.subr.mxu1 %v132_v27 }
  0x1c   :  { %415 = vmatprep.subr.mxu0 %v30_v24  ;;  %447 = vmatpush3.msra.mxu1 %v132_v27 }
  0x1d   :  { %416 = vmatpush3.msra.mxu0 %v30_v24  ;;  %448 = vmatprep.subr.mxu1 %v131_v30 }
  0x1e   :  { %417 = vmatprep.subr.mxu0 %v29_v26  ;;  %449 = vmatpush3.msra.mxu1 %v131_v30 }
  0x1f   :  { %418 = vmatpush3.msra.mxu0 %v29_v26  ;;  %450 = vmatprep.subr.mxu1 %v130_v31 }
  0x20   :  { %419 = vmatprep.subr.mxu0 %v28_v28  ;;  %451 = vmatpush3.msra.mxu1 %v130_v31 }
  0x21   :  { %420 = vmatpush3.msra.mxu0 %v28_v28  ;;  %452 = vmatprep.subr.mxu1 %v129_v32 }
  0x22   :  { %422 = vmatmul.mubr.f32.vlgmr.msra.gmra.mxu0 %v27_v29  ;;  %453 = vmatpush3.msra.mxu1 %v129_v32 }
  0x23   :  { %454 = vmatprep.subr.mxu1 %v128_v33  ;;  %459 = vmatprep.subr.mxu0 %v243_v34 }
  0x24   :  { %455 = vmatpush3.msra.mxu1 %v128_v33  ;;  %460 = vmatpush3.msra.mxu0 %v243_v34 }
  0x25   :  { %461 = vmatprep.subr.mxu0 %v242_v35 }
  0x26   :  { %462 = vmatpush3.msra.mxu0 %v242_v35 }
  0x27   :  { %463 = vmatprep.subr.mxu0 %v241_v36 }
  0x28   :  { %464 = vmatpush3.msra.mxu0 %v241_v36 }
  0x29   :  { %465 = vmatprep.subr.mxu0 %v240_v37 }
  0x2a   :  { %466 = vmatpush3.msra.mxu0 %v240_v37 }
  0x2b   :  { %467 = vmatprep.subr.mxu0 %v239_v38 }
  0x2c   :  { %468 = vmatpush3.msra.mxu0 %v239_v38 }
  0x2d   :  { %469 = vmatprep.subr.mxu0 %v238_v39 }
  0x2e   :  { %470 = vmatpush3.msra.mxu0 %v238_v39 }
  0x2f   :  { %471 = vmatprep.subr.mxu0 %v237_v40 }
  0x30   :  { %472 = vmatpush3.msra.mxu0 %v237_v40 }
  0x31   :  { %473 = vmatprep.subr.mxu0 %v236_v41 }
  0x32   :  { %474 = vmatpush3.msra.mxu0 %v236_v41 }
  0x33   :  { %475 = vmatprep.subr.mxu0 %v235_v42 }
  0x34   :  { %476 = vmatpush3.msra.mxu0 %v235_v42 }
  0x35   :  { %477 = vmatprep.subr.mxu0 %v234_v43 }
  0x36   :  { %478 = vmatpush3.msra.mxu0 %v234_v43 }
  0x37   :  { %479 = vmatprep.subr.mxu0 %v233_v44 }
  0x38   :  { %480 = vmatpush3.msra.mxu0 %v233_v44 }
  0x39   :  { %481 = vmatprep.subr.mxu0 %v232_v45 }
  0x3a   :  { %482 = vmatpush3.msra.mxu0 %v232_v45 }
  0x3b   :  { %483 = vmatprep.subr.mxu0 %v231_v53 }
  0x3c   :  { %484 = vmatpush3.msra.mxu0 %v231_v53 }
  0x3d   :  { %485 = vmatprep.subr.mxu0 %v230_v54 }
  0x3e   :  { %486 = vmatpush3.msra.mxu0 %v230_v54 }
  0x3f   :  { %487 = vmatprep.subr.mxu0 %v229_v55 }
  0x40   :  { %488 = vmatpush3.msra.mxu0 %v229_v55 }
  0x41   :  { %489 = vmatprep.subr.mxu0 %v228_v56 }
  0x42   :  { %490 = vmatpush3.msra.mxu0 %v228_v56 }
  0xe2   :  { %v423_v47 = vpop.f32.mrf.mxu0 }
  0xe3   :  { %v123_v48 = vadd.f32 %v423_v47, %v332_v46 }
  0xe4   :  { %v117_v49 = vpop.f32.mrf.mxu0 }
  0xe5   :  { %v118_v50 = vadd.f32 %v332_v46, %v117_v49  ;;  %v127_v52 = vmax.f32 %v123_v48, 0.0 }
  0xe7   :  { %v126_v51 = vmax.f32 %v118_v50, 0.0 }
  0xe9   :  { %456 = vmatprep.mubr.f32.mxu1 %v126_v51 }
  0xea   :  { %457 = vmatmul.mubr.f32.vlgmr.msra.gmra.mxu1 %v127_v52 }
 0x1aa   :  { %v458_v58 = vpop.f32.mrf.mxu1 }
 0x1ab   :  { %v223_v59 = vadd.f32 %v458_v58, %v333_v57 }
 0x1ac   :  { %v217_v60 = vpop.f32.mrf.mxu1 }
 0x1ad   :  { %v218_v61 = vadd.f32 %v333_v57, %v217_v60  ;;  %v227_v63 = vmax.f32 %v223_v59, 0.0 }
 0x1af   :  { %v226_v62 = vmax.f32 %v218_v61, 0.0 }
 0x1b1   :  { %491 = vmatprep.mubr.f32.mxu0 %v226_v62 }
 0x1b2   :  { %492 = vmatmul.mubr.f32.vlgmr.msra.gmra.mxu0 %v227_v63 }
 0x272   :  { %v493_v1 = vpop.f32.mrf.mxu0 }
 0x273   :  { %v323_v2 = vadd.f32 %v493_v1, %v334_v0 }
 0x274   :  { %v317_v3 = vpop.f32.mrf.mxu0 }
 0x275   :  { %327 = vst [vmem:[%s706_s7 + $0x8] sm:$0xff] %v323_v2  ;;  %v318_v4 = vadd.f32 %v334_v0, %v317_v3 }
 0x277   :  { %326 = vst [vmem:[%s706_s7] sm:$0xff] %v318_v4 }

</bundles_post_ra>
